<compile_context>
chip_gen: v7x
topology: tpu7x:2x2x1
jax: 0.10.0
libtpu: 0.0.40
codegen_flags: <defaults>
</compile_context>

<pallas_src>
import jax
import jax.numpy as jnp
import numpy as np
from jax.experimental import pallas as pl
from jax.experimental.pallas import tpu as pltpu

B = 2        # batch
S = 8        # seq_len
H = 32       # hidden_dim
EPS = 1e-5   # LayerNorm eps (PyTorch default)


def _layer_norm(x, gamma, beta):
    mu = jnp.mean(x, axis=-1, keepdims=True)
    var = jnp.mean((x - mu) ** 2, axis=-1, keepdims=True)
    return (x - mu) * jax.lax.rsqrt(var + EPS) * gamma + beta


# ---------------------------------------------------------------------------
# Kernels (single grid step, whole batch processed at once)
# ---------------------------------------------------------------------------
def _gcn_kernel_fc(x_ref, w_ref, p_ref, out_ref):
    """adjacency=None (fully connected) path.

    x_ref : [B*S, H] f32      w_ref : [H, 2H] bf16 (W_self | W_edge)
    p_ref : [8, 2H] f32       row0 = b_self|b_edge, row1 = gamma|beta
    """
    x = x_ref[...].astype(jnp.bfloat16)
    # One packed MXU matmul, bf16 operands, f32 accumulation: [16,32]@[32,64]
    z = jnp.dot(x, w_ref[...], preferred_element_type=jnp.float32)   # [B*S, 2H]
    z = z + p_ref[0:1, :]                                            # packed bias
    gamma = p_ref[1:2, :H]
    beta = p_ref[1:2, H:]
    zs = z[:, :H]                                                    # x@Ws + bs
    ze = z[:, H:]                                                    # x@We + be
    # ones(S,S) @ (x@We + be) == per-batch rowsum of the biased edge proj.
    parts = []
    for b in range(B):                                               # static unroll
        s = jnp.sum(ze[b * S:(b + 1) * S, :], axis=0, keepdims=True)  # [1, H]
        parts.append(jnp.broadcast_to(s, (S, H)))
    neigh = jnp.concatenate(parts, axis=0)                           # [B*S, H]
    comb = jnp.maximum(zs + neigh, 0.0)
    out_ref[...] = _layer_norm(comb, gamma, beta)


def _gcn_kernel_adj(x_ref, adj_ref, w_ref, p_ref, out_ref):
    """explicit adjacency path.  adj_ref: [B*S, S] (per-batch blocks stacked)."""
    x = x_ref[...].astype(jnp.bfloat16)
    z = jnp.dot(x, w_ref[...], preferred_element_type=jnp.float32)   # [B*S, 2H]
    z = z + p_ref[0:1, :]
    gamma = p_ref[1:2, :H]
    beta = p_ref[1:2, H:]
    zs = z[:, :H]
    ze = z[:, H:]
    adj = adj_ref[...]                                               # [B*S, S]
    parts = []
    for b in range(B):                                               # static unroll
        a_b = adj[b * S:(b + 1) * S, :]                              # [S, S]
        e_b = ze[b * S:(b + 1) * S, :]                               # [S, H]
        parts.append(jnp.dot(a_b, e_b, preferred_element_type=jnp.float32))
    neigh = jnp.concatenate(parts, axis=0)                           # [B*S, H]
    comb = jnp.maximum(zs + neigh, 0.0)
    out_ref[...] = _layer_norm(comb, gamma, beta)


# ---------------------------------------------------------------------------
# Wrapper
# ---------------------------------------------------------------------------
def _full(shape):
    return pl.BlockSpec(shape, lambda i: (0,) * len(shape))


def gcn_layer(node_features, params, adjacency=None):
    w_packed, p_packed = params
    x2d = node_features.reshape(B * S, H)
    out_shape = jax.ShapeDtypeStruct((B * S, H), jnp.float32)
    cp = pltpu.CompilerParams(dimension_semantics=("arbitrary",))

    if adjacency is None:
        out2d = pl.pallas_call(
            _gcn_kernel_fc,
            out_shape=out_shape,
            grid=(1,),
            in_specs=[_full((B * S, H)), _full((H, 2 * H)), _full((8, 2 * H))],
            out_specs=_full((B * S, H)),
            compiler_params=cp,
        )(x2d, w_packed, p_packed)
    else:
        adj2d = adjacency.reshape(B * S, S)
        out2d = pl.pallas_call(
            _gcn_kernel_adj,
            out_shape=out_shape,
            grid=(1,),
            in_specs=[_full((B * S, H)), _full((B * S, S)),
                      _full((H, 2 * H)), _full((8, 2 * H))],
            out_specs=_full((B * S, H)),
            compiler_params=cp,
        )(x2d, adj2d, w_packed, p_packed)
    return out2d.reshape(B, S, H)


# ---------------------------------------------------------------------------
# Parameter init (packed, deterministic)
# ---------------------------------------------------------------------------
def init_params(key):
    ks = jax.random.split(key, 6)
    n = lambda k, shape: jax.random.normal(k, shape, jnp.float32) * 0.1
    w_self = n(ks[0], (H, H))           # stored [in, out] (transposed vs torch)
    w_edge = n(ks[1], (H, H))
    b_self = n(ks[2], (H,))
    b_edge = n(ks[3], (H,))
    gamma = 1.0 + n(ks[4], (H,))
    beta = n(ks[5], (H,))
    w_packed = jnp.concatenate([w_self, w_edge], axis=1).astype(jnp.bfloat16)  # [H, 2H]
    p_packed = jnp.zeros((8, 2 * H), jnp.float32)                    # sublane-padded
    p_packed = p_packed.at[0].set(jnp.concatenate([b_self, b_edge]))
    p_packed = p_packed.at[1].set(jnp.concatenate([gamma, beta]))
    return (w_packed, p_packed)


# ---------------------------------------------------------------------------
# Pure-JAX reference (mirrors the kernel's bf16-operand / f32-accumulate dot)
# ---------------------------------------------------------------------------
def reference(node_features, params, adjacency=None):
    w_packed, p_packed = params
    b_self, b_edge = p_packed[0, :H], p_packed[0, H:]
    gamma, beta = p_packed[1, :H], p_packed[1, H:]
    w_self, w_edge = w_packed[:, :H], w_packed[:, H:]
    xb = node_features.astype(jnp.bfloat16)
    self_f = jnp.einsum('bsh,hd->bsd', xb, w_self,
                        preferred_element_type=jnp.float32) + b_self
    e = jnp.einsum('bsh,hd->bsd', xb, w_edge,
                   preferred_element_type=jnp.float32) + b_edge
    if adjacency is None:
        adjacency = jnp.ones((B, S, S), jnp.float32)
    neigh = jnp.einsum('bij,bjh->bih', adjacency, e)
    comb = jnp.maximum(self_f + neigh, 0.0)
    mu = comb.mean(-1, keepdims=True)
    var = ((comb - mu) ** 2).mean(-1, keepdims=True)
    return (comb - mu) / jnp.sqrt(var + EPS) * gamma + beta


if __name__ == "__main__":
    key = jax.random.PRNGKey(0)
    k_x, k_adj, k_param = jax.random.split(key, 3)
    node_features = jax.random.normal(k_x, (B, S, H), jnp.float32)
    adjacency = jax.nn.sigmoid(jax.random.normal(k_adj, (B, S, S), jnp.float32))

    params = init_params(k_param)

    # Fully-connected path (adjacency=None, the GCNFold usage).
    out_fc = jax.block_until_ready(gcn_layer(node_features, params, None))
    ref_fc = reference(node_features, params, None)
    np.testing.assert_allclose(np.asarray(out_fc), np.asarray(ref_fc),
                               rtol=2e-3, atol=2e-3)

    # Explicit adjacency path.
    out_adj = jax.block_until_ready(gcn_layer(node_features, params, adjacency))
    ref_adj = reference(node_features, params, adjacency)
    np.testing.assert_allclose(np.asarray(out_adj), np.asarray(ref_adj),
                               rtol=2e-3, atol=2e-3)

    print("KERNEL_OK")
</pallas_src>

<mosaic_0001>
module attributes {stable_mosaic.version = 11 : i64} {
  func.func @_gcn_kernel_fc(%arg0: i32, %arg1: memref<16x32xf32, #tpu.memory_space<vmem>>, %arg2: memref<32x64xbf16, #tpu.memory_space<vmem>>, %arg3: memref<8x64xf32, #tpu.memory_space<vmem>>, %arg4: memref<16x32xf32, #tpu.memory_space<vmem>>) attributes {dimension_semantics = [#tpu.dimension_semantics<arbitrary>], iteration_bounds = array<i64: 1>, scalar_prefetch = 0 : i64, scratch_operands = 0 : i64, tpu.core_type = #tpu.core_type<tc>, window_params = [{pipeline_mode = #tpu.pipeline_mode<synchronous>, transform_indices = @transform_0, window_bounds = array<i64: 16, 32>}, {pipeline_mode = #tpu.pipeline_mode<synchronous>, transform_indices = @transform_1, window_bounds = array<i64: 32, 64>}, {pipeline_mode = #tpu.pipeline_mode<synchronous>, transform_indices = @transform_2, window_bounds = array<i64: 8, 64>}, {pipeline_mode = #tpu.pipeline_mode<synchronous>, transform_indices = @transform_3, window_bounds = array<i64: 16, 32>}]} {
    %c0 = arith.constant 0 : index
    %c0_0 = arith.constant 0 : index
    %0 = vector.load %arg1[%c0, %c0_0] : memref<16x32xf32, #tpu.memory_space<vmem>>, vector<16x32xf32>
    %1 = arith.truncf %0 : vector<16x32xf32> to vector<16x32xbf16>
    %c0_1 = arith.constant 0 : index
    %c0_2 = arith.constant 0 : index
    %2 = vector.load %arg2[%c0_1, %c0_2] : memref<32x64xbf16, #tpu.memory_space<vmem>>, vector<32x64xbf16>
    %cst = arith.constant dense<0.000000e+00> : vector<16x64xf32>
    %3 = tpu.matmul %1, %2, %cst {dimension_numbers = #tpu.dot_dimension_numbers<[1], [0], [0], [1], [0, 0, 1, 1], [], []>} : vector<16x32xbf16>, vector<32x64xbf16>, vector<16x64xf32> -> vector<16x64xf32>
    %c0_3 = arith.constant 0 : index
    %c0_4 = arith.constant 0 : index
    %4 = vector.load %arg3[%c0_3, %c0_4] : memref<8x64xf32, #tpu.memory_space<vmem>>, vector<1x64xf32>
    %5 = vector.broadcast %4 : vector<1x64xf32> to vector<16x64xf32>
    %6 = arith.addf %3, %5 : vector<16x64xf32>
    %c1 = arith.constant 1 : index
    %c0_5 = arith.constant 0 : index
    %7 = vector.load %arg3[%c1, %c0_5] : memref<8x64xf32, #tpu.memory_space<vmem>>, vector<1x32xf32>
    %c1_6 = arith.constant 1 : index
    %c32 = arith.constant 32 : index
    %8 = vector.load %arg3[%c1_6, %c32] : memref<8x64xf32, #tpu.memory_space<vmem>>, vector<1x32xf32>
    %9 = vector.extract_strided_slice %6 {offsets = [0, 0], sizes = [16, 32], strides = [1, 1]} : vector<16x64xf32> to vector<16x32xf32>
    %10 = vector.extract_strided_slice %6 {offsets = [0, 32], sizes = [16, 32], strides = [1, 1]} : vector<16x64xf32> to vector<16x32xf32>
    %11 = vector.extract_strided_slice %10 {offsets = [0, 0], sizes = [8, 32], strides = [1, 1]} : vector<16x32xf32> to vector<8x32xf32>
    %cst_7 = arith.constant dense<0.000000e+00> : vector<32xf32>
    %12 = vector.multi_reduction <add>, %11, %cst_7 [0] : vector<8x32xf32> to vector<32xf32>
    %13 = vector.shape_cast %12 : vector<32xf32> to vector<1x32xf32>
    %14 = vector.shape_cast %13 : vector<1x32xf32> to vector<1x32xf32>
    %15 = vector.broadcast %14 : vector<1x32xf32> to vector<8x32xf32>
    %16 = vector.extract_strided_slice %10 {offsets = [8, 0], sizes = [8, 32], strides = [1, 1]} : vector<16x32xf32> to vector<8x32xf32>
    %cst_8 = arith.constant dense<0.000000e+00> : vector<32xf32>
    %17 = vector.multi_reduction <add>, %16, %cst_8 [0] : vector<8x32xf32> to vector<32xf32>
    %18 = vector.shape_cast %17 : vector<32xf32> to vector<1x32xf32>
    %19 = vector.shape_cast %18 : vector<1x32xf32> to vector<1x32xf32>
    %20 = vector.broadcast %19 : vector<1x32xf32> to vector<8x32xf32>
    %21 = tpu.concatenate %15, %20 in 0 : vector<8x32xf32>, vector<8x32xf32> -> vector<16x32xf32>
    %22 = arith.addf %9, %21 : vector<16x32xf32>
    %cst_9 = arith.constant 0.000000e+00 : f32
    %23 = vector.broadcast %cst_9 : f32 to vector<16x32xf32>
    %24 = arith.maximumf %22, %23 : vector<16x32xf32>
    %cst_10 = arith.constant dense<0.000000e+00> : vector<16xf32>
    %25 = vector.multi_reduction <add>, %24, %cst_10 [1] : vector<16x32xf32> to vector<16xf32>
    %26 = vector.shape_cast %25 : vector<16xf32> to vector<16x1xf32>
    %cst_11 = arith.constant 3.200000e+01 : f32
    %27 = vector.broadcast %cst_11 : f32 to vector<16x1xf32>
    %28 = arith.divf %26, %27 : vector<16x1xf32>
    %29 = vector.broadcast %28 : vector<16x1xf32> to vector<16x32xf32>
    %30 = arith.subf %24, %29 : vector<16x32xf32>
    %31 = arith.mulf %30, %30 : vector<16x32xf32>
    %cst_12 = arith.constant dense<0.000000e+00> : vector<16xf32>
    %32 = vector.multi_reduction <add>, %31, %cst_12 [1] : vector<16x32xf32> to vector<16xf32>
    %33 = vector.shape_cast %32 : vector<16xf32> to vector<16x1xf32>
    %cst_13 = arith.constant 3.200000e+01 : f32
    %34 = vector.broadcast %cst_13 : f32 to vector<16x1xf32>
    %35 = arith.divf %33, %34 : vector<16x1xf32>
    %36 = vector.broadcast %28 : vector<16x1xf32> to vector<16x32xf32>
    %37 = arith.subf %24, %36 : vector<16x32xf32>
    %cst_14 = arith.constant 9.99999974E-6 : f32
    %38 = vector.broadcast %cst_14 : f32 to vector<16x1xf32>
    %39 = arith.addf %35, %38 : vector<16x1xf32>
    %40 = math.rsqrt %39 : vector<16x1xf32>
    %41 = vector.broadcast %40 : vector<16x1xf32> to vector<16x32xf32>
    %42 = arith.mulf %37, %41 : vector<16x32xf32>
    %43 = vector.broadcast %7 : vector<1x32xf32> to vector<16x32xf32>
    %44 = arith.mulf %42, %43 : vector<16x32xf32>
    %45 = vector.broadcast %8 : vector<1x32xf32> to vector<16x32xf32>
    %46 = arith.addf %44, %45 : vector<16x32xf32>
    %c0_15 = arith.constant 0 : index
    %c0_16 = arith.constant 0 : index
    %47 = vector.load %arg4[%c0_15, %c0_16] : memref<16x32xf32, #tpu.memory_space<vmem>>, vector<16x32xf32>
    tpu.vector_store %arg4[%c0_15, %c0_16], %46 {strides = array<i32>} : memref<16x32xf32, #tpu.memory_space<vmem>>, vector<16x32xf32>,
    return
  }
  func.func @transform_0(%arg0: i32) -> (i32, i32) {
    %c0_i32 = arith.constant 0 : i32
    %c0_i32_0 = arith.constant 0 : i32
    %c0_i32_1 = arith.constant 0 : i32
    return %c0_i32, %c0_i32_0 : i32, i32
  }
  func.func @transform_1(%arg0: i32) -> (i32, i32) {
    %c0_i32 = arith.constant 0 : i32
    %c0_i32_0 = arith.constant 0 : i32
    %c0_i32_1 = arith.constant 0 : i32
    return %c0_i32, %c0_i32_0 : i32, i32
  }
  func.func @transform_2(%arg0: i32) -> (i32, i32) {
    %c0_i32 = arith.constant 0 : i32
    %c0_i32_0 = arith.constant 0 : i32
    %c0_i32_1 = arith.constant 0 : i32
    return %c0_i32, %c0_i32_0 : i32, i32
  }
  func.func @transform_3(%arg0: i32) -> (i32, i32) {
    %c0_i32 = arith.constant 0 : i32
    %c0_i32_0 = arith.constant 0 : i32
    %c0_i32_1 = arith.constant 0 : i32
    return %c0_i32, %c0_i32_0 : i32, i32
  }
}

</mosaic_0001>

<bundles_post_ra>
// kernel: tpu_custom_call.1
= control target key start
LH: loop header
LB: loop body
LE: loop exit
PB: predicated region body
PF: predicated region fallthrough
CT: control target
= control target key end

     0   :  { %8 = vsyncpa [#allocation3], 0  ;;  %s430_s0 = inlined_call_operand.hbm [shape: f32[16,32], index: 0, kind: input, shape index: {}]   ;;  %s431_s1 = inlined_call_operand.hbm [shape: bf16[32,64], index: 1, kind: input, shape index: {}]   ;;  %s432_s2 = inlined_call_operand.hbm [shape: f32[8,64], index: 2, kind: input, shape index: {}]   ;;  %s433_s3 = inlined_call_operand.hbm [shape: f32[16,32], index: 3, kind: output, shape index: {}]  }
   0x1   :  { %9 = vsyncpa [#allocation6], 0 }
   0x2   :  { %10 = vsyncpa [#allocation4], 0  ;;  %s338_s12 = smov [#allocation5]   ;;  %s244_s16 = scalar_lea.hbm %s431_s1, 256 }
   0x3   :  { %s28_s13 = sshll.u32 %s338_s12, 4  ;;  %p245_p0 = scmp.ne.s32.totalorder %s431_s1, %s244_s16  ;;  %s29_s13 = int_to_ptr.vmem [resolvable:$true] %s28_s13 }
   0x4   :  { %p248_p1 = scmp.lt.u32.totalorder %s244_s16, %s431_s1 }
   0x6   :  { %p250_p2 = pnand %p248_p1, %p245_p0 }
   0x8   :  { %253 = shalt.err (!%p250_p2)
}
   0x9   :  { %s254_s21 = scalar_lea.vmem %s29_s13, 256  ;;  %p259_p4 = scmp.lt.s32.totalorder %s29_s13, %s29_s13 }
   0xa   :  { %p255_p3 = scmp.ne.s32.totalorder %s29_s13, %s254_s21  ;;  %p260_p5 = scmp.lt.s32.totalorder %s254_s21, %s254_s21 }
   0xc   :  { %p261_p6 = por %p260_p5, %p259_p4 }
   0xe   :  { %p262_p7 = pnand %p261_p6, %p255_p3 }
  0x10   :  { %265 = shalt.err (!%p262_p7)
}
  0x11   :  { %s339_s22 = smov 64   ;;  %s340_s23 = smov 4  }
  0x12   :  { %34 = dma.hbm_to_vmem [thread:$0]  %s431_s1, 256, %s29_s13, [#allocation6], %s339_s22, %s339_s22, %s340_s23  }
  0x13   :  { %s341_s26 = smov [#allocation2]   ;;  %s266_s30 = scalar_lea.hbm %s430_s0, 256 }
  0x14   :  { %s16_s27 = sshll.u32 %s341_s26, 4  ;;  %p267_p8 = scmp.ne.s32.totalorder %s430_s0, %s266_s30  ;;  %s17_s27 = int_to_ptr.vmem [resolvable:$true] %s16_s27 }
  0x15   :  { %p270_p9 = scmp.lt.u32.totalorder %s266_s30, %s430_s0 }
  0x17   :  { %p272_p10 = pnand %p270_p9, %p267_p8 }
  0x19   :  { %275 = shalt.err (!%p272_p10)
}
  0x1a   :  { %s276_s8 = scalar_lea.vmem %s17_s27, 256  ;;  %p281_p12 = scmp.lt.s32.totalorder %s17_s27, %s17_s27 }
  0x1b   :  { %p277_p11 = scmp.ne.s32.totalorder %s17_s27, %s276_s8  ;;  %p282_p13 = scmp.lt.s32.totalorder %s276_s8, %s276_s8 }
  0x1d   :  { %p283_p0 = por %p282_p13, %p281_p12 }
  0x1f   :  { %p284_p1 = pnand %p283_p0, %p277_p11 }
  0x21   :  { %287 = shalt.err (!%p284_p1)
}
  0x22   :  { %s342_s1 = smov 128   ;;  %s343_s9 = smov 8  }
  0x23   :  { %22 = dma.hbm_to_vmem [thread:$0]  %s430_s0, 256, %s17_s27, [#allocation3], %s342_s1, %s342_s1, %s343_s9  }
  0x24   :  { %s344_s12 = smov [#allocation7]   ;;  %s288_s16 = scalar_lea.hbm %s432_s2, 128 }
  0x25   :  { %s41_s13 = sshll.u32 %s344_s12, 4  ;;  %p289_p2 = scmp.ne.s32.totalorder %s432_s2, %s288_s16  ;;  %s42_s13 = int_to_ptr.vmem [resolvable:$true] %s41_s13 }
  0x26   :  { %p292_p3 = scmp.lt.u32.totalorder %s288_s16, %s432_s2 }
  0x28   :  { %p294_p4 = pnand %p292_p3, %p289_p2 }
  0x2a   :  { %297 = shalt.err (!%p294_p4)
}
  0x2b   :  { %s298_s21 = scalar_lea.vmem %s42_s13, 128  ;;  %p303_p6 = scmp.lt.s32.totalorder %s42_s13, %s42_s13 }
  0x2c   :  { %p299_p5 = scmp.ne.s32.totalorder %s42_s13, %s298_s21  ;;  %p304_p7 = scmp.lt.s32.totalorder %s298_s21, %s298_s21 }
  0x2e   :  { %p305_p8 = por %p304_p7, %p303_p6 }
  0x30   :  { %p306_p9 = pnand %p305_p8, %p299_p5 }
  0x32   :  { %309 = shalt.err (!%p306_p9)
}
  0x33   :  { %44 = dma.hbm_to_vmem [thread:$0]  %s432_s2, 128, %s42_s13, [#allocation6]  }
  0x34   :  { %332 = dma.done.wait [#allocation3], 256  }
  0x35   :  { %333 = vsyncadd [#allocation3], 4294967040 }
  0x36   :  { %334 = dma.done.wait [#allocation6], 384  }
  0x37   :  { %335 = vsyncadd [#allocation6], 4294966912  ;;  %v345_v0 = vmov 0.0   ;;  %vm346_vm0 = vmmov 0   ;;  %v238_v1 = vld [vmem:[#allocation5] sm:$0xff]   ;;  %v239_v2 = vld [vmem:[#allocation5 + $0x8] sm:$0xff]  }
  0x38   :  { %219 = vmatprep.subr.bf16.mxu0 %v345_v0  ;;  %223 = vmatprep.mubr.msk.bf16.mxu0 %vm346_vm0, %v345_v0  ;;  %v55_v3 = vld [vmem:[#allocation2] sm:$0xff]  ;;  %v56_v4 = vld [vmem:[#allocation2 + $0x8] sm:$0xff]  ;;  %vm79_vm1 = vcmask 261120   ;;  %vm125_vm2 = vcmask 523520   ;;  %s347_s2 = smov 96   ;;  %s348_s23 = smov [#allocation8]  }
  0x39   :  { %220 = vmatpush3.bf16.msra.mxu0 %v238_v1  ;;  %v57_v5 = vpack.c.bf16 %v56_v4, %v55_v3  ;;  %v211_v6 = vld [vmem:[#allocation7] ss:$0 sm:$0xff]  ;;  %v215_v45 = vld [vmem:[#allocation7 + $0x1] ss:$0 sm:$0xff]  ;;  %s198_s24 = sshll.u32 %s348_s23, 4  ;;  %s199_s24 = int_to_ptr.vmem [resolvable:$true] %s198_s24 }
  0x3a   :  { %221 = vmatprep.subr.bf16.mxu0 %v345_v0  ;;  %s310_s25 = scalar_lea.vmem %s199_s24, 256  ;;  %p315_p11 = scmp.lt.s32.totalorder %s199_s24, %s199_s24 }
  0x3b   :  { %p311_p10 = scmp.ne.s32.totalorder %s199_s24, %s310_s25  ;;  %p316_p12 = scmp.lt.s32.totalorder %s310_s25, %s310_s25 }
  0x3d   :  { %222 = vmatpush3.bf16.msra.mxu0 %v239_v2  ;;  %p317_p13 = por %p316_p12, %p315_p11 }
  0x3f   :  { %p318_p0 = pnand %p317_p13, %p311_p10 }
  0x40   :  { %224 = vmatmul.mubr.msk.bf16.vlgmr.msra.gmra.mrb[0].mxu0 %vm79_vm1, %v57_v5 }
 0x113   :  { %v117_v7 = vpop.f32.mrb[0].mxu0 }
 0x114   :  { %v118_v8 = vadd.f32 %v211_v6, %v117_v7  ;;  %v225_v9 = vpop.f32.mrb[1].mxu0 }
 0x115   :  { %v120_v10 = vpop.f32.mrb[2].mxu0 }
 0x116   :  { %v126_v11 = vsel %vm125_vm2, %v118_v8, 0.0  ;;  %v121_v12 = vadd.f32 %v211_v6, %v120_v10  ;;  %v226_v13 = vpop.f32.mrb[3].mxu0 }
 0x117   :  { %v127_v14 = vrot.slane %v126_v11, 4 }
 0x118   :  { %v133_v15 = vsel %vm125_vm2, %v121_v12, 0.0 }
 0x119   :  { %v128_v16 = vadd.f32 %v127_v14, %v126_v11  ;;  %v134_v17 = vrot.slane %v133_v15, 4 }
 0x11b   :  { %v135_v18 = vadd.f32 %v134_v17, %v133_v15  ;;  %v129_v19 = vrot.slane %v128_v16, 2 }
 0x11d   :  { %v136_v20 = vrot.slane %v135_v18, 2  ;;  %v130_v21 = vadd.f32 %v129_v19, %v128_v16 }
 0x11f   :  { %v137_v22 = vadd.f32 %v136_v20, %v135_v18  ;;  %v131_v23 = vrot.slane %v130_v21, 1 }
 0x121   :  { %v132_v24 = vadd.f32 %v131_v23, %v130_v21  ;;  %v138_v25 = vrot.slane %v137_v22, 1 }
 0x123   :  { %142 = vrot.lane.b32.xlu0 %v132_v24, %s347_s2  ;;  %v139_v26 = vadd.f32 %v138_v25, %v137_v22 }
 0x127   :  { %144 = vrot.lane.b32.xlu0 %v139_v26, %s347_s2 }
 0x195   :  { %v143_v27 = vpop.permute.xlu0 %142 }
 0x196   :  { %v148_v28 = vadd.f32 %v143_v27, %v118_v8 }
 0x198   :  { %v150_v29 = vmax.f32 %v148_v28, 0.0 }
 0x199   :  { %v145_v30 = vpop.permute.xlu0 %144 }
 0x19a   :  { %v149_v31 = vadd.f32 %v145_v30, %v121_v12  ;;  %v152_v32 = vsel %vm79_vm1, %v150_v29, 0.0 }
 0x19b   :  { %153 = vadd.xlane.f32.xlu1 %v152_v32 }
 0x19c   :  { %v151_v33 = vmax.f32 %v149_v31, 0.0 }
 0x19e   :  { %v155_v34 = vsel %vm79_vm1, %v151_v33, 0.0 }
 0x19f   :  { %156 = vadd.xlane.f32.xlu1 %v155_v34 }
 0x228   :  { %v154_v35 = vpop.xlane.xlu1 %153 }
 0x229   :  { %v159_v36 = vmul.f32 0.03125, %v154_v35 }
 0x22b   :  { %v161_v37 = vsub.f32 %v150_v29, %v159_v36 }
 0x22c   :  { %v157_v38 = vpop.xlane.xlu1 %156 }
 0x22d   :  { %v160_v39 = vmul.f32 0.03125, %v157_v38  ;;  %v163_v40 = vmul.f32 %v161_v37, %v161_v37 }
 0x22f   :  { %v162_v41 = vsub.f32 %v151_v33, %v160_v39  ;;  %v165_v42 = vsel %vm79_vm1, %v163_v40, 0.0 }
 0x230   :  { %166 = vadd.xlane.f32.xlu0 %v165_v42 }
 0x231   :  { %v164_v43 = vmul.f32 %v162_v41, %v162_v41 }
 0x233   :  { %v168_v44 = vsel %vm79_vm1, %v164_v43, 0.0 }
 0x234   :  { %169 = vadd.xlane.f32.xlu1 %v168_v44 }
 0x245   :  { %186 = vrot.lane.b32.xlu1 %v215_v45, %s347_s2 }
 0x2bd   :  { %v167_v46 = vpop.xlane.xlu0 %166 }
 0x2be   :  { %v171_v47 = vmul.f32 0.03125, %v167_v46 }
 0x2c0   :  { %v173_v48 = vadd.f32 1e-05, %v171_v47 }
 0x2c1   :  { %v170_v49 = vpop.xlane.xlu1 %169 }
 0x2c2   :  { %240 = vrsqrt.f32 %v173_v48  ;;  %v172_v50 = vmul.f32 0.03125, %v170_v49 }
 0x2c4   :  { %v174_v51 = vadd.f32 1e-05, %v172_v50 }
 0x2c5   :  { %v187_v54 = vpop.permute.xlu1 %186 }
 0x2c6   :  { %242 = vrsqrt.f32 %v174_v51 }
 0x2cc   :  { %v241_v52 = vpop.eup %240 }
 0x2cd   :  { %v177_v53 = vmul.f32 %v241_v52, %v161_v37 }
 0x2cf   :  { %v183_v55 = vmul.f32 %v215_v45, %v177_v53 }
 0x2d0   :  { %v243_v56 = vpop.eup %242 }
 0x2d1   :  { %v178_v57 = vmul.f32 %v243_v56, %v162_v41  ;;  %v189_v58 = vadd.f32 %v187_v54, %v183_v55 }
 0x2d3   :  { %v184_v59 = vmul.f32 %v215_v45, %v178_v57  ;;  %191 = vst.msk [vmem:[#allocation8] sm:$0xff] %vm79_vm1, %v189_v58 }
 0x2d5   :  { %v190_v60 = vadd.f32 %v187_v54, %v184_v59 }
 0x2d7   :  { %192 = vst.msk [vmem:[#allocation8 + $0x8] sm:$0xff] %vm79_vm1, %v190_v60 }
 0x2d8   :  { %321 = shalt.err (!%p318_p0)
}
 0x2d9   :  { %s322_s28 = scalar_lea.hbm %s433_s3, 256 }
 0x2da   :  { %p323_p1 = scmp.ne.s32.totalorder %s433_s3, %s322_s28  ;;  %p326_p2 = scmp.lt.u32.totalorder %s322_s28, %s433_s3 }
 0x2dc   :  { %p328_p3 = pnand %p326_p2, %p323_p1 }
 0x2de   :  { %331 = shalt.err (!%p328_p3)
}
 0x2df   :  { %204 = dma.vmem_to_hbm [thread:$0]  %s199_s24, 256, %s433_s3, [#allocation4], %s342_s1, %s342_s1, %s343_s9  }
 0x2e0   :  { %336 = dma.done.wait [#allocation4], 256  }
 0x2e1   :  { %337 = vsyncadd [#allocation4], 4294967040 }
 0x2e2   :  { %208 = vsyncpa [#allocation3], 1 }
 0x2e3   :  { %209 = vsyncpa [#allocation6], 1 }
 0x2e4   :  { %210 = vsyncpa [#allocation4], 1 }

</bundles_post_ra>
